<compile_context>
chip_gen: v5e
topology: v5e:2x2
jax: 0.10.0
libtpu: 0.0.40
codegen_flags: <defaults>
</compile_context>

<pallas_src>
import functools

import jax
import jax.numpy as jnp
from jax.experimental import pallas as pl
from jax.experimental.pallas import tpu as pltpu


def _mlp_conv_kernel(x_ref, w1_ref, c2_ref, w2_ref, b2_ref, o_ref, *,
                     NH, H, W, C1, C2, approximate_gelu):
    WC2 = W * C2
    BIAS0 = 16  # row offset of the effective-bias slab inside c2_ref (8-aligned)

    x2d = x_ref[...]                                            # (N*H, W*C1)

    # ---- linear1 (1x1 conv): lane-dense block-diagonal MXU matmul.
    # Its bias b1 is folded into the effective-bias slab added after the dwc.
    h = jnp.dot(x2d, w1_ref[...], preferred_element_type=jnp.float32)   # (NH, WC2)

    # ---- depthwise 3x3 (stride 1, zero pad 1, groups=C2), fully in registers.
    # Column (x) shifts: 2 lane rolls total, hoisted out of the tap loop; the
    # x-border zeroing is baked into the tiled tap weights (no per-tap selects).
    h_xm1 = pltpu.roll(h, shift=C2, axis=1)        # lane-group x sees value from x-1
    h_xp1 = pltpu.roll(h, shift=WC2 - C2, axis=1)  # lane-group x sees value from x+1
    cols = (h_xm1, h, h_xp1)

    def dy_sum(dy):  # sum over dx of (border-baked tap) * column-shifted h, one dy
        s = cols[0] * c2_ref[dy * 3 + 0:dy * 3 + 1, :]
        s = s + cols[1] * c2_ref[dy * 3 + 1:dy * 3 + 2, :]
        s = s + cols[2] * c2_ref[dy * 3 + 2:dy * 3 + 3, :]
        return s

    p_up, p_mid, p_dn = dy_sum(0), dy_sum(1), dy_sum(2)

    # Row (y) shifts applied once to the per-dy sums (2 shifts instead of 6).
    # Images are stacked along rows, so mask the rows at every image border —
    # this same mask also covers the (zero-padded) top/bottom picture edges.
    # TODO(synk): if these concats materialize VMEM copies, switch to
    # pltpu.roll(..., axis=0) sublane rotation (the same row masks apply).
    zrow = jnp.zeros((1, WC2), dtype=p_up.dtype)
    up = jnp.concatenate([zrow, p_up[:NH - 1, :]], axis=0)   # row r <- p_up[r-1]
    dn = jnp.concatenate([p_dn[1:, :], zrow], axis=0)        # row r <- p_dn[r+1]

    row = jax.lax.broadcasted_iota(jnp.int32, (NH, WC2), 0) % H
    acc = p_mid + jnp.where(row > 0, up, 0.0) + jnp.where(row < H - 1, dn, 0.0)

    # effective bias = dwc(constant-b1 plane) + b_dw (precomputed in the wrapper)
    acc = acc + c2_ref[BIAS0:BIAS0 + NH, :]

    # ---- activation
    # TODO(synk): PyTorch nn.GELU() default is the exact erf form; the tanh
    # approximation used by default here (EUP-friendly, proven Mosaic lowering)
    # deviates by ~1e-3.  Pass approximate_gelu=False for erf parity.
    if approximate_gelu:
        g = jax.nn.gelu(acc, approximate=True)
    else:
        g = 0.5 * acc * (1.0 + jax.lax.erf(acc * (1.0 / jnp.sqrt(2.0).astype(acc.dtype))))

    # ---- linear2 (1x1 conv) back to C1: lane-dense block-diagonal MXU matmul.
    out = jnp.dot(g, w2_ref[...], preferred_element_type=jnp.float32) + b2_ref[...]
    o_ref[...] = out.astype(o_ref.dtype)


def pack_params(params, hw_shape, n):
    """One-time weight repacking; call at init, NOT per forward step."""
    H, W = hw_shape
    C1, C2 = params["w1"].shape
    WC1, WC2 = W * C1, W * C2
    dt = params["w1"].dtype

    # Scaling guard (perf review): the block-diagonal trick inflates weight
    # footprint by W^2 and MXU work by W; fine for small channels, but switch to
    # a plain per-pixel (pixels, C) matmul layout once C grows / W grows.
    assert C2 < 128 and WC2 <= 2048 and WC1 <= 2048, (
        "block-diagonal 1x1-conv specialization targets small W*C; use a "
        "per-pixel (N*H*W, C) matmul layout for larger channel counts")

    # Block-diagonal 1x1-conv weights so both matmuls stay in the lane-dense view.
    eye_w = jnp.eye(W, dtype=dt)
    w1_blk = jnp.einsum("xy,cd->xcyd", eye_w, params["w1"]).reshape(WC1, WC2)
    w2_blk = jnp.einsum("xy,dc->xdyc", eye_w, params["w2"]).reshape(WC2, WC1)

    # Depthwise taps tiled across W with the x-border zeroing baked in:
    #   dx=0 taps (read x-1) are zeroed on the x==0 lane group,
    #   dx=2 taps (read x+1) are zeroed on the x==W-1 lane group.
    wdw_t = jnp.tile(params["w_dw"].reshape(9, C2), (1, W))            # (9, WC2)
    lane = jnp.arange(WC2)
    left_edge = lane < C2
    right_edge = lane >= (W - 1) * C2
    dx = jnp.arange(9) % 3
    kill = ((dx == 0)[:, None] & left_edge[None, :]) | \
           ((dx == 2)[:, None] & right_edge[None, :])
    wdw_t = jnp.where(kill, 0.0, wdw_t).astype(dt)

    # Effective bias slab: dwc(constant b1 plane) + b_dw, computed exactly with
    # zero padding (border positions see fewer taps).  Tiled over the batch so
    # it adds directly onto the stacked (N*H, W*C2) accumulator.
    b1_plane = jnp.broadcast_to(params["b1"].reshape(1, 1, C2), (H, W, C2))
    b1p = jnp.pad(b1_plane, ((1, 1), (1, 1), (0, 0)))
    eff = jnp.broadcast_to(params["b_dw"].reshape(1, 1, C2), (H, W, C2))
    for dy in range(3):
        for dxx in range(3):
            eff = eff + b1p[dy:dy + H, dxx:dxx + W, :] * \
                params["w_dw"][dy * 3 + dxx].reshape(1, 1, C2)
    eff_t = jnp.tile(eff.reshape(H, WC2), (n, 1)).astype(dt)           # (N*H, WC2)

    # Pack all W*C2-wide constants into one operand (fewer DMA descriptors):
    #   rows [0, 9)        : border-baked depthwise taps
    #   rows [9, 16)       : zero padding (8-sublane alignment of the bias slab)
    #   rows [16, 16+N*H)  : effective bias slab
    pad = jnp.zeros((16 - 9, WC2), dt)
    c2pack = jnp.concatenate([wdw_t, pad, eff_t], axis=0)

    b2_t = jnp.tile(params["b2"].reshape(1, C1), (1, W)).astype(dt)    # (1, WC1)
    return {"w1_blk": w1_blk, "w2_blk": w2_blk, "c2pack": c2pack, "b2_t": b2_t,
            "C2": C2}


def mlp_with_conv(x_nlc, hw_shape, packed, *, approximate_gelu=True):
    H, W = hw_shape
    N, L, C1 = x_nlc.shape
    assert L == H * W
    C2 = packed["C2"]
    WC1 = W * C1
    NH = N * H

    # NLC row-major viewed as the stacked lane-dense (N*H, W*C1) slab: pure reshape.
    x2d = x_nlc.reshape(NH, WC1)

    kernel = functools.partial(_mlp_conv_kernel, NH=NH, H=H, W=W, C1=C1, C2=C2,
                               approximate_gelu=approximate_gelu)

    # Single grid step (no grid): the whole batch is one block; all operands fit
    # comfortably in VMEM (~130 KB total), so there is nothing to pipeline.
    out = pl.pallas_call(
        kernel,
        out_shape=jax.ShapeDtypeStruct((NH, WC1), x_nlc.dtype),
    )(x2d, packed["w1_blk"], packed["c2pack"], packed["w2_blk"], packed["b2_t"])

    return out.reshape(N, L, C1)  # lane-dense slab -> NLC (pure reshape)


def reference(x_nlc, hw_shape, params, *, approximate_gelu=True):
    """Pure-JAX reference (straightforward NHWC math, no Pallas tricks)."""
    H, W = hw_shape
    N, L, C1 = x_nlc.shape
    C2 = params["w1"].shape[1]
    x = x_nlc.reshape(N, H, W, C1)
    h = jnp.einsum("nhwc,cd->nhwd", x, params["w1"]) + params["b1"].reshape(1, 1, 1, C2)
    hp = jnp.pad(h, ((0, 0), (1, 1), (1, 1), (0, 0)))
    acc = jnp.zeros_like(h) + params["b_dw"].reshape(1, 1, 1, C2)
    for dy in range(3):
        for dx in range(3):
            tap = params["w_dw"][dy * 3 + dx].reshape(1, 1, 1, C2)
            acc = acc + hp[:, dy:dy + H, dx:dx + W, :] * tap
    if approximate_gelu:
        h = jax.nn.gelu(acc, approximate=True)
    else:
        h = 0.5 * acc * (1.0 + jax.lax.erf(acc / jnp.sqrt(2.0).astype(acc.dtype)))
    out = jnp.einsum("nhwd,dc->nhwc", h, params["w2"]) + params["b2"].reshape(1, 1, 1, C1)
    return out.reshape(N, L, C1)


if __name__ == "__main__":
    N, H, W = 2, 16, 16
    embed_dims, expansion = 4, 2
    C1, C2 = embed_dims, embed_dims * expansion

    key = jax.random.PRNGKey(0)
    ks = jax.random.split(key, 7)
    x = jax.random.normal(ks[0], (N, H * W, C1), jnp.float32)
    params = {
        "w1":  jax.random.normal(ks[1], (C1, C2), jnp.float32) * 0.5,   # linear1 (1x1 conv)
        "b1":  jax.random.normal(ks[2], (1, C2), jnp.float32) * 0.1,
        "w_dw": jax.random.normal(ks[3], (9, C2), jnp.float32) * 0.3,   # dwc 3x3, groups=C2
        "b_dw": jax.random.normal(ks[4], (1, C2), jnp.float32) * 0.1,
        "w2":  jax.random.normal(ks[5], (C2, C1), jnp.float32) * 0.5,   # linear2 (1x1 conv)
        "b2":  jax.random.normal(ks[6], (1, C1), jnp.float32) * 0.1,
    }

    packed = pack_params(params, (H, W), N)   # one-time init-side repacking
    out = jax.block_until_ready(mlp_with_conv(x, (H, W), packed))
    ref = reference(x, (H, W), params)

    assert out.shape == (N, H * W, C1)
    err = float(jnp.max(jnp.abs(out - ref)))
    assert jnp.allclose(out, ref, atol=2e-4, rtol=2e-4), err
    print("KERNEL_OK")
</pallas_src>

<mosaic_0001>
module attributes {stable_mosaic.version = 11 : i64} {
  func.func @_mlp_conv_kernel(%arg0: memref<32x64xf32, #tpu.memory_space<vmem>>, %arg1: memref<64x128xf32, #tpu.memory_space<vmem>>, %arg2: memref<48x128xf32, #tpu.memory_space<vmem>>, %arg3: memref<128x64xf32, #tpu.memory_space<vmem>>, %arg4: memref<1x64xf32, #tpu.memory_space<vmem>>, %arg5: memref<32x64xf32, #tpu.memory_space<vmem>>) attributes {dimension_semantics = [], scalar_prefetch = 0 : i64, scratch_operands = 0 : i64, tpu.core_type = #tpu.core_type<tc>} {
    %c0 = arith.constant 0 : index
    %c0_0 = arith.constant 0 : index
    %0 = vector.load %arg0[%c0, %c0_0] : memref<32x64xf32, #tpu.memory_space<vmem>>, vector<32x64xf32>
    %c0_1 = arith.constant 0 : index
    %c0_2 = arith.constant 0 : index
    %1 = vector.load %arg1[%c0_1, %c0_2] : memref<64x128xf32, #tpu.memory_space<vmem>>, vector<64x128xf32>
    %cst = arith.constant dense<0.000000e+00> : vector<32x128xf32>
    %2 = tpu.matmul %0, %1, %cst {dimension_numbers = #tpu.dot_dimension_numbers<[1], [0], [0], [1], [0, 0, 1, 1], [], []>} : vector<32x64xf32>, vector<64x128xf32>, vector<32x128xf32> -> vector<32x128xf32>
    %c8_i32 = arith.constant 8 : i32
    %3 = tpu.dynamic_rotate %2 by %c8_i32 dim 1 : vector<32x128xf32>, i32 -> vector<32x128xf32>
    %c120_i32 = arith.constant 120 : i32
    %4 = tpu.dynamic_rotate %2 by %c120_i32 dim 1 : vector<32x128xf32>, i32 -> vector<32x128xf32>
    %c0_3 = arith.constant 0 : index
    %c0_4 = arith.constant 0 : index
    %5 = vector.load %arg2[%c0_3, %c0_4] : memref<48x128xf32, #tpu.memory_space<vmem>>, vector<1x128xf32>
    %6 = vector.broadcast %5 : vector<1x128xf32> to vector<32x128xf32>
    %7 = arith.mulf %3, %6 : vector<32x128xf32>
    %c1 = arith.constant 1 : index
    %c0_5 = arith.constant 0 : index
    %8 = vector.load %arg2[%c1, %c0_5] : memref<48x128xf32, #tpu.memory_space<vmem>>, vector<1x128xf32>
    %9 = vector.broadcast %8 : vector<1x128xf32> to vector<32x128xf32>
    %10 = arith.mulf %2, %9 : vector<32x128xf32>
    %11 = arith.addf %7, %10 : vector<32x128xf32>
    %c2 = arith.constant 2 : index
    %c0_6 = arith.constant 0 : index
    %12 = vector.load %arg2[%c2, %c0_6] : memref<48x128xf32, #tpu.memory_space<vmem>>, vector<1x128xf32>
    %13 = vector.broadcast %12 : vector<1x128xf32> to vector<32x128xf32>
    %14 = arith.mulf %4, %13 : vector<32x128xf32>
    %15 = arith.addf %11, %14 : vector<32x128xf32>
    %c3 = arith.constant 3 : index
    %c0_7 = arith.constant 0 : index
    %16 = vector.load %arg2[%c3, %c0_7] : memref<48x128xf32, #tpu.memory_space<vmem>>, vector<1x128xf32>
    %17 = vector.broadcast %16 : vector<1x128xf32> to vector<32x128xf32>
    %18 = arith.mulf %3, %17 : vector<32x128xf32>
    %c4 = arith.constant 4 : index
    %c0_8 = arith.constant 0 : index
    %19 = vector.load %arg2[%c4, %c0_8] : memref<48x128xf32, #tpu.memory_space<vmem>>, vector<1x128xf32>
    %20 = vector.broadcast %19 : vector<1x128xf32> to vector<32x128xf32>
    %21 = arith.mulf %2, %20 : vector<32x128xf32>
    %22 = arith.addf %18, %21 : vector<32x128xf32>
    %c5 = arith.constant 5 : index
    %c0_9 = arith.constant 0 : index
    %23 = vector.load %arg2[%c5, %c0_9] : memref<48x128xf32, #tpu.memory_space<vmem>>, vector<1x128xf32>
    %24 = vector.broadcast %23 : vector<1x128xf32> to vector<32x128xf32>
    %25 = arith.mulf %4, %24 : vector<32x128xf32>
    %26 = arith.addf %22, %25 : vector<32x128xf32>
    %c6 = arith.constant 6 : index
    %c0_10 = arith.constant 0 : index
    %27 = vector.load %arg2[%c6, %c0_10] : memref<48x128xf32, #tpu.memory_space<vmem>>, vector<1x128xf32>
    %28 = vector.broadcast %27 : vector<1x128xf32> to vector<32x128xf32>
    %29 = arith.mulf %3, %28 : vector<32x128xf32>
    %c7 = arith.constant 7 : index
    %c0_11 = arith.constant 0 : index
    %30 = vector.load %arg2[%c7, %c0_11] : memref<48x128xf32, #tpu.memory_space<vmem>>, vector<1x128xf32>
    %31 = vector.broadcast %30 : vector<1x128xf32> to vector<32x128xf32>
    %32 = arith.mulf %2, %31 : vector<32x128xf32>
    %33 = arith.addf %29, %32 : vector<32x128xf32>
    %c8 = arith.constant 8 : index
    %c0_12 = arith.constant 0 : index
    %34 = vector.load %arg2[%c8, %c0_12] : memref<48x128xf32, #tpu.memory_space<vmem>>, vector<1x128xf32>
    %35 = vector.broadcast %34 : vector<1x128xf32> to vector<32x128xf32>
    %36 = arith.mulf %4, %35 : vector<32x128xf32>
    %37 = arith.addf %33, %36 : vector<32x128xf32>
    %cst_13 = arith.constant 0.000000e+00 : f32
    %38 = vector.broadcast %cst_13 : f32 to vector<1x128xf32>
    %39 = vector.extract_strided_slice %15 {offsets = [0, 0], sizes = [31, 128], strides = [1, 1]} : vector<32x128xf32> to vector<31x128xf32>
    %40 = tpu.concatenate %38, %39 in 0 : vector<1x128xf32>, vector<31x128xf32> -> vector<32x128xf32>
    %41 = vector.extract_strided_slice %37 {offsets = [1, 0], sizes = [31, 128], strides = [1, 1]} : vector<32x128xf32> to vector<31x128xf32>
    %42 = tpu.concatenate %41, %38 in 0 : vector<31x128xf32>, vector<1x128xf32> -> vector<32x128xf32>
    %43 = tpu.iota {dimensions = array<i32: 0>} : vector<32x128xi32>
    %c16_i32 = arith.constant 16 : i32
    %c0_i32 = arith.constant 0 : i32
    %44 = arith.cmpi eq, %c16_i32, %c0_i32 : i32
    %c1_i32 = arith.constant 1 : i32
    %45 = arith.select %44, %c1_i32, %c16_i32 : i32
    %46 = vector.broadcast %45 : i32 to vector<32x128xi32>
    %47 = arith.remsi %43, %46 : vector<32x128xi32>
    %c0_i32_14 = arith.constant 0 : i32
    %48 = vector.broadcast %c0_i32_14 : i32 to vector<32x128xi32>
    %49 = arith.cmpi ne, %47, %48 : vector<32x128xi32>
    %c0_i32_15 = arith.constant 0 : i32
    %50 = vector.broadcast %c0_i32_15 : i32 to vector<32x128xi32>
    %51 = arith.cmpi slt, %47, %50 : vector<32x128xi32>
    %c0_i32_16 = arith.constant 0 : i32
    %52 = arith.cmpi slt, %45, %c0_i32_16 : i32
    %53 = vector.broadcast %52 : i1 to vector<32x128xi1>
    %54 = vector.broadcast %53 : vector<32x128xi1> to vector<32x128xi1>
    %55 = arith.xori %51, %54 : vector<32x128xi1>
    %56 = arith.andi %55, %49 : vector<32x128xi1>
    %57 = vector.broadcast %45 : i32 to vector<32x128xi32>
    %58 = arith.addi %47, %57 : vector<32x128xi32>
    %59 = arith.select %56, %58, %47 : vector<32x128xi1>, vector<32x128xi32>
    %c0_i32_17 = arith.constant 0 : i32
    %60 = vector.broadcast %c0_i32_17 : i32 to vector<32x128xi32>
    %61 = arith.cmpi sgt, %59, %60 : vector<32x128xi32>
    %cst_18 = arith.constant 0.000000e+00 : f32
    %62 = vector.broadcast %cst_18 : f32 to vector<32x128xf32>
    %63 = arith.select %61, %40, %62 : vector<32x128xi1>, vector<32x128xf32>
    %64 = arith.addf %26, %63 : vector<32x128xf32>
    %c15_i32 = arith.constant 15 : i32
    %65 = vector.broadcast %c15_i32 : i32 to vector<32x128xi32>
    %66 = arith.cmpi slt, %59, %65 : vector<32x128xi32>
    %cst_19 = arith.constant 0.000000e+00 : f32
    %67 = vector.broadcast %cst_19 : f32 to vector<32x128xf32>
    %68 = arith.select %66, %42, %67 : vector<32x128xi1>, vector<32x128xf32>
    %69 = arith.addf %64, %68 : vector<32x128xf32>
    %c16 = arith.constant 16 : index
    %c0_20 = arith.constant 0 : index
    %70 = vector.load %arg2[%c16, %c0_20] : memref<48x128xf32, #tpu.memory_space<vmem>>, vector<32x128xf32>
    %71 = arith.addf %69, %70 : vector<32x128xf32>
    %72 = arith.mulf %71, %71 : vector<32x128xf32>
    %73 = arith.mulf %71, %72 : vector<32x128xf32>
    %cst_21 = arith.constant 4.471500e-02 : f32
    %74 = vector.broadcast %cst_21 : f32 to vector<32x128xf32>
    %75 = arith.mulf %74, %73 : vector<32x128xf32>
    %76 = arith.addf %71, %75 : vector<32x128xf32>
    %cst_22 = arith.constant 0.797884583 : f32
    %77 = vector.broadcast %cst_22 : f32 to vector<32x128xf32>
    %78 = arith.mulf %77, %76 : vector<32x128xf32>
    %79 = math.tanh %78 : vector<32x128xf32>
    %cst_23 = arith.constant 1.000000e+00 : f32
    %80 = vector.broadcast %cst_23 : f32 to vector<32x128xf32>
    %81 = arith.addf %80, %79 : vector<32x128xf32>
    %cst_24 = arith.constant 5.000000e-01 : f32
    %82 = vector.broadcast %cst_24 : f32 to vector<32x128xf32>
    %83 = arith.mulf %82, %81 : vector<32x128xf32>
    %84 = arith.mulf %71, %83 : vector<32x128xf32>
    %c0_25 = arith.constant 0 : index
    %c0_26 = arith.constant 0 : index
    %85 = vector.load %arg3[%c0_25, %c0_26] : memref<128x64xf32, #tpu.memory_space<vmem>>, vector<128x64xf32>
    %cst_27 = arith.constant dense<0.000000e+00> : vector<32x64xf32>
    %86 = tpu.matmul %84, %85, %cst_27 {dimension_numbers = #tpu.dot_dimension_numbers<[1], [0], [0], [1], [0, 0, 1, 1], [], []>} : vector<32x128xf32>, vector<128x64xf32>, vector<32x64xf32> -> vector<32x64xf32>
    %c0_28 = arith.constant 0 : index
    %c0_29 = arith.constant 0 : index
    %87 = vector.load %arg4[%c0_28, %c0_29] : memref<1x64xf32, #tpu.memory_space<vmem>>, vector<1x64xf32>
    %88 = vector.broadcast %87 : vector<1x64xf32> to vector<32x64xf32>
    %89 = arith.addf %86, %88 : vector<32x64xf32>
    %c0_30 = arith.constant 0 : index
    %c0_31 = arith.constant 0 : index
    %90 = vector.load %arg5[%c0_30, %c0_31] : memref<32x64xf32, #tpu.memory_space<vmem>>, vector<32x64xf32>
    tpu.vector_store %arg5[%c0_30, %c0_31], %89 {strides = array<i32>} : memref<32x64xf32, #tpu.memory_space<vmem>>, vector<32x64xf32>,
    return
  }
}

</mosaic_0001>

<bundles_post_ra>
// kernel: tpu_custom_call.1
= control target key start
LH: loop header
LB: loop body
LE: loop exit
PB: predicated region body
PF: predicated region fallthrough
CT: control target
= control target key end

     0   :  { %s780_s0 = inlined_call_operand.vmem [shape: f32[32,64], index: 0, kind: input, shape index: {}]   ;;  %s781_s1 = inlined_call_operand.vmem [shape: f32[64,128], index: 1, kind: input, shape index: {}]   ;;  %s782_s2 = inlined_call_operand.vmem [shape: f32[48,128], index: 2, kind: input, shape index: {}]   ;;  %s783_s3 = inlined_call_operand.vmem [shape: f32[128,64], index: 3, kind: input, shape index: {}]   ;;  %s784_s4 = inlined_call_operand.vmem [shape: f32[1,64], index: 4, kind: input, shape index: {}]   ;;  %s785_s5 = inlined_call_operand.hbm [shape: f32[32,64], index: 5, kind: output, shape index: {}]  }
   0x1   :  { %v32_v0 = vld [vmem:[%s781_s1 + $0x38] sm:$0xff]  ;;  %v31_v1 = vld [vmem:[%s781_s1 + $0x30] sm:$0xff]  ;;  %v30_v2 = vld [vmem:[%s781_s1 + $0x28] sm:$0xff] }
   0x2   :  { %54 = vmatpush.msra.mxu0 %v32_v0  ;;  %v29_v3 = vld [vmem:[%s781_s1 + $0x20] sm:$0xff]  ;;  %v28_v4 = vld [vmem:[%s781_s1 + $0x18] sm:$0xff] }
   0x4   :  { %55 = vmatpush.msra.mxu0 %v31_v1 }
   0x6   :  { %56 = vmatpush.msra.mxu0 %v30_v2 }
   0x8   :  { %57 = vmatpush.msra.mxu0 %v29_v3 }
   0x9   :  { %10 = vsyncpa [#allocation3], 0  ;;  %v27_v5 = vld [vmem:[%s781_s1 + $0x10] sm:$0xff]  ;;  %v26_v6 = vld [vmem:[%s781_s1 + $0x8] sm:$0xff]  ;;  %vm33_vm0 = vcmask 523264   ;;  %s479_s16 = smov 120   ;;  %v203_v21 = vlaneseq }
   0xa   :  { %58 = vmatpush.msra.mxu0 %v28_v4  ;;  %v25_v7 = vld [vmem:[%s781_s1] sm:$0xff]  ;;  %v22_v9 = vld [vmem:[%s780_s0 + $0x8] sm:$0xff]  ;;  %v23_v10 = vld [vmem:[%s780_s0 + $0x10] sm:$0xff]  ;;  %s480_s17 = smov 8   ;;  %vm190_vm1 = vcmask 1046528   ;;  %vm173_vm3 = vcmask 1040384  }
   0xb   :  { %v21_v8 = vld [vmem:[%s780_s0] sm:$0xff]  ;;  %v24_v11 = vld [vmem:[%s780_s0 + $0x18] sm:$0xff]  ;;  %v338_v17 = vld [vmem:[%s783_s3 + $0x70] sm:$0xff]  ;;  %v595_v26 = vshrl.u32 %v203_v21, 7  ;;  %s383_s25 = sshll.u32 %s785_s5, 4  ;;  %s481_s26 = smov [#allocation2]   ;;  %s384_s25 = int_to_ptr.hbm [resolvable:$true] %s383_s25 }
   0xc   :  { %59 = vmatpush.msra.mxu0 %v27_v5  ;;  %v339_v16 = vld [vmem:[%s783_s3 + $0x78] sm:$0xff]  ;;  %v337_v18 = vld [vmem:[%s783_s3 + $0x68] sm:$0xff]  ;;  %v336_v19 = vld [vmem:[%s783_s3 + $0x60] sm:$0xff]  ;;  %s381_s27 = sshll.u32 %s481_s26, 4  ;;  %s382_s27 = int_to_ptr.vmem [resolvable:$true] %s381_s27 }
   0xd   :  { %400 = vmatpush.msra.mxu3 %v339_v16  ;;  %399 = vmatpush.msra.mxu2 %v339_v16  ;;  %v335_v22 = vld [vmem:[%s783_s3 + $0x58] sm:$0xff]  ;;  %v334_v23 = vld [vmem:[%s783_s3 + $0x50] sm:$0xff]  ;;  %v435_v24 = vld [vmem:[%s782_s2 + $0x1] ss:$0 sm:$0xff]  ;;  %v207_v36 = vadd.s32 24, %v595_v26  ;;  %v206_v52 = vadd.s32 16, %v595_v26 }
   0xe   :  { %60 = vmatpush.msra.mxu0 %v26_v6  ;;  %344 = vmatpush.msra.mxu1 %v339_v16  ;;  %v436_v25 = vld [vmem:[%s782_s2 + $0x4] ss:$0 sm:$0xff]  ;;  %v333_v27 = vld [vmem:[%s783_s3 + $0x48] sm:$0xff]  ;;  %v437_v28 = vld [vmem:[%s782_s2 + $0x7] ss:$0 sm:$0xff] }
   0xf   :  { %402 = vmatpush.msra.mxu3 %v338_v17  ;;  %401 = vmatpush.msra.mxu2 %v338_v17  ;;  %v606_v29 = vld [vmem:[%s782_s2 + $0x6] ss:$0 sm:$0xff]  ;;  %v614_v31 = vld [vmem:[%s782_s2] ss:$0 sm:$0xff]  ;;  %v331_v34 = vld [vmem:[%s783_s3 + $0x38] sm:$0xff]  ;;  %v233_v54 = vand.u32 15, %v207_v36 }
  0x10   :  { %61 = vmatpush.msra.mxu0 %v25_v7  ;;  %345 = vmatpush.msra.mxu1 %v338_v17  ;;  %v332_v30 = vld [vmem:[%s783_s3 + $0x40] sm:$0xff]  ;;  %v626_v35 = vld [vmem:[%s782_s2 + $0x8] ss:$0 sm:$0xff]  ;;  %v330_v43 = vld [vmem:[%s783_s3 + $0x30] sm:$0xff]  ;;  %v226_v6 = vand.u32 15, %v206_v52 }
  0x11   :  { %395 = vmatmul.msk.f32.vlgmr.msra.gmra.mxu0 %vm33_vm0, %v21_v8  ;;  %404 = vmatpush.msra.mxu3 %v337_v18  ;;  %v644_v44 = vld [vmem:[%s782_s2 + $0x2] ss:$0 sm:$0xff]  ;;  %v657_v49 = vld [vmem:[%s782_s2 + $0x3] ss:$0 sm:$0xff]  ;;  %v329_v53 = vld [vmem:[%s783_s3 + $0x28] sm:$0xff]  ;;  %vm690_vm2 = vcmp.lt.s32.totalorder %v233_v54, 15 }
  0x12   :  { %403 = vmatpush.msra.mxu2 %v337_v18  ;;  %346 = vmatpush.msra.mxu1 %v337_v18  ;;  %v674_v61 = vld [vmem:[%s782_s2 + $0x5] ss:$0 sm:$0xff]  ;;  %v327_v8 = vld [vmem:[%s783_s3 + $0x18] sm:$0xff]  ;;  %v326_v18 = vld [vmem:[%s783_s3 + $0x10] sm:$0xff]  ;;  %vm713_vm4 = vcmp.gt.s32.totalorder %v226_v6, 0 }
  0x13   :  { %406 = vmatpush.msra.mxu3 %v336_v19  ;;  %v328_v63 = vld [vmem:[%s783_s3 + $0x20] sm:$0xff] }
  0x14   :  { %405 = vmatpush.msra.mxu2 %v336_v19  ;;  %347 = vmatpush.msra.mxu1 %v336_v19 }
  0x15   :  { %408 = vmatpush.msra.mxu3 %v335_v22 }
  0x16   :  { %407 = vmatpush.msra.mxu2 %v335_v22  ;;  %348 = vmatpush.msra.mxu1 %v335_v22 }
  0x17   :  { %410 = vmatpush.msra.mxu3 %v334_v23 }
  0x18   :  { %409 = vmatpush.msra.mxu2 %v334_v23  ;;  %349 = vmatpush.msra.mxu1 %v334_v23 }
  0x19   :  { %396 = vmatmul.msk.f32.gmra.mxu0 %vm33_vm0, %v22_v9  ;;  %412 = vmatpush.msra.mxu3 %v333_v27 }
  0x1a   :  { %411 = vmatpush.msra.mxu2 %v333_v27  ;;  %350 = vmatpush.msra.mxu1 %v333_v27  ;;  %v325_v27 = vld [vmem:[%s783_s3 + $0x8] sm:$0xff] }
  0x1b   :  { %414 = vmatpush.msra.mxu3 %v332_v30 }
  0x1c   :  { %413 = vmatpush.msra.mxu2 %v332_v30  ;;  %351 = vmatpush.msra.mxu1 %v332_v30 }
  0x1d   :  { %416 = vmatpush.msra.mxu3 %v331_v34 }
  0x1e   :  { %415 = vmatpush.msra.mxu2 %v331_v34  ;;  %352 = vmatpush.msra.mxu1 %v331_v34 }
  0x1f   :  { %418 = vmatpush.msra.mxu3 %v330_v43 }
  0x20   :  { %417 = vmatpush.msra.mxu2 %v330_v43  ;;  %353 = vmatpush.msra.mxu1 %v330_v43  ;;  %v324_v43 = vld [vmem:[%s783_s3] sm:$0xff] }
  0x21   :  { %397 = vmatmul.msk.f32.gmra.mxu0 %vm33_vm0, %v23_v10  ;;  %420 = vmatpush.msra.mxu3 %v329_v53 }
  0x22   :  { %419 = vmatpush.msra.mxu2 %v329_v53  ;;  %354 = vmatpush.msra.mxu1 %v329_v53 }
  0x23   :  { %422 = vmatpush.msra.mxu3 %v328_v63 }
  0x24   :  { %421 = vmatpush.msra.mxu2 %v328_v63  ;;  %355 = vmatpush.msra.mxu1 %v328_v63 }
  0x25   :  { %424 = vmatpush.msra.mxu3 %v327_v8 }
  0x26   :  { %423 = vmatpush.msra.mxu2 %v327_v8  ;;  %356 = vmatpush.msra.mxu1 %v327_v8 }
  0x27   :  { %426 = vmatpush.msra.mxu3 %v326_v18 }
  0x28   :  { %425 = vmatpush.msra.mxu2 %v326_v18  ;;  %357 = vmatpush.msra.mxu1 %v326_v18 }
  0x29   :  { %398 = vmatmul.msk.f32.gmra.mxu0 %vm33_vm0, %v24_v11  ;;  %428 = vmatpush.msra.mxu3 %v325_v27 }
  0x2a   :  { %427 = vmatpush.msra.mxu2 %v325_v27  ;;  %358 = vmatpush.msra.mxu1 %v325_v27 }
  0x2b   :  { %430 = vmatpush.msra.mxu3 %v324_v43 }
  0x2c   :  { %429 = vmatpush.msra.mxu2 %v324_v43  ;;  %359 = vmatpush.msra.mxu1 %v324_v43 }
  0x8e   :  { %v63_v12 = vpop.f32.mrf.mxu0 }
  0x8f   :  { %v629_v37 = vmul.f32 %v435_v24, %v63_v12  ;;  %v634_v41 = vmul.f32 %v436_v25, %v63_v12  ;;  %v636_v42 = vmul.f32 %v437_v28, %v63_v12 }
  0x96   :  { %v553_v13 = vpop.f32.mrf.mxu0 }
  0x97   :  { %85 = vrot.lane.b32.xlu1 %v553_v13, %s479_s16  ;;  %77 = vrot.lane.b32.xlu0 %v553_v13, %s480_s17  ;;  %v100_v39 = vmul.f32 %v435_v24, %v553_v13  ;;  %v649_v46 = vmul.f32 %v436_v25, %v553_v13  ;;  %v152_v51 = vmul.f32 %v437_v28, %v553_v13  ;;  %v695_v13 = vadd.s32 8, %v595_v26 }
  0x9e   :  { %v558_v14 = vpop.f32.mrf.mxu0 }
  0x9f   :  { %87 = vrot.lane.b32.xlu1 %v558_v14, %s479_s16  ;;  %79 = vrot.lane.b32.xlu0 %v558_v14, %s480_s17  ;;  %v101_v56 = vmul.f32 %v435_v24, %v558_v14  ;;  %v127_v57 = vmul.f32 %v436_v25, %v558_v14  ;;  %v153_v62 = vmul.f32 %v437_v28, %v558_v14 }
  0xa6   :  { %v563_v15 = vpop.f32.mrf.mxu0 }
  0xa7   :  { %83 = vrot.lane.b32.xlu1 %v63_v12, %s479_s16  ;;  %75 = vrot.lane.b32.xlu0 %v63_v12, %s480_s17  ;;  %v154_v48 = vmul.f32 %v437_v28, %v563_v15  ;;  %v102_v58 = vmul.f32 %v435_v24, %v563_v15  ;;  %v128_v59 = vmul.f32 %v436_v25, %v563_v15 }
  0xa8   :  { %81 = vrot.lane.b32.xlu2 %v563_v15, %s480_s17 }
  0xb0   :  { %89 = vrot.lane.b32.xlu2 %v563_v15, %s479_s16 }
 0x102   :  { %v581_v20 = vpop.permute.xlu2 %81 }
 0x103   :  { %v148_v38 = vmul.f32 %v606_v29, %v581_v20  ;;  %v96_v50 = vmul.f32 %v614_v31, %v581_v20  ;;  %v122_v4 = vmul.f32 %v657_v49, %v581_v20 }
 0x105   :  { %v158_v60 = vadd.f32 %v154_v48, %v148_v38  ;;  %v106_v3 = vadd.f32 %v102_v58, %v96_v50  ;;  %v132_v28 = vadd.f32 %v128_v59, %v122_v4 }
 0x109   :  { %v616_v32 = vpop.permute.xlu1 %85  ;;  %v618_v33 = vpop.permute.xlu0 %77 }
 0x10a   :  { %v90_v40 = vpop.permute.xlu2 %89  ;;  %v94_v45 = vmul.f32 %v614_v31, %v618_v33  ;;  %v146_v47 = vmul.f32 %v606_v29, %v618_v33  ;;  %v110_v9 = vmul.f32 %v644_v44, %v616_v32  ;;  %v162_v10 = vmul.f32 %v626_v35, %v616_v32 }
 0x10b   :  { %v164_v55 = vmul.f32 %v626_v35, %v90_v40  ;;  %v112_v2 = vmul.f32 %v644_v44, %v90_v40  ;;  %v138_v14 = vmul.f32 %v674_v61, %v90_v40  ;;  %v212_v40 = vand.u32 15, %v595_v26 }
 0x10c   :  { %v104_v0 = vadd.f32 %v100_v39, %v94_v45  ;;  %v156_v1 = vadd.f32 %v152_v51, %v146_v47  ;;  %v219_v45 = vand.u32 15, %v695_v13  ;;  %v120_v47 = vmul.f32 %v657_v49, %v618_v33 }
 0x10d   :  { %v168_v12 = vadd.f32 %v164_v55, %v158_v60  ;;  %v116_v21 = vadd.f32 %v112_v2, %v106_v3  ;;  %v142_v48 = vadd.f32 %v138_v14, %v132_v28  ;;  %vm754_vm5 = vcmp.gt.s32.totalorder %v212_v40, 0 }
 0x10e   :  { %v704_v19 = vadd.f32 %v110_v9, %v104_v0  ;;  %v706_v20 = vadd.f32 %v162_v10, %v156_v1  ;;  %v136_v9 = vmul.f32 %v674_v61, %v616_v32  ;;  %vm269_vm6 = vcmp.lt.s32.totalorder %v219_v45, 15 }
 0x10f   :  { %v196_v30 = vrot.slane %v168_v12, 1  ;;  %v179_v50 = vrot.slane %v116_v21, 7 }
 0x110   :  { %v175_v52 = vrot.slane %v704_v19, 7  ;;  %v192_v26 = vrot.slane %v706_v20, 1 }
 0x111   :  { %v88_v5 = vpop.permute.xlu1 %87  ;;  %v80_v7 = vpop.permute.xlu0 %79 }
 0x112   :  { %v95_v15 = vmul.f32 %v614_v31, %v80_v7  ;;  %v121_v16 = vmul.f32 %v657_v49, %v80_v7  ;;  %v147_v17 = vmul.f32 %v606_v29, %v80_v7  ;;  %v111_v22 = vmul.f32 %v644_v44, %v88_v5 }
 0x113   :  { %v163_v23 = vmul.f32 %v626_v35, %v88_v5  ;;  %v137_v51 = vmul.f32 %v674_v61, %v88_v5 }
 0x114   :  { %v105_v24 = vadd.f32 %v101_v56, %v95_v15  ;;  %v157_v25 = vadd.f32 %v153_v62, %v147_v17  ;;  %v131_v36 = vadd.f32 %v127_v57, %v121_v16  ;;  %v202_v57 = vsel %vm190_vm1, %v196_v30, 0.0 }
 0x115   :  { %v275_v4 = vsel %vm690_vm2, %v202_v57, 0.0 }
 0x116   :  { %v115_v38 = vadd.f32 %v111_v22, %v105_v24  ;;  %v167_v39 = vadd.f32 %v163_v23, %v157_v25  ;;  %v141_v58 = vadd.f32 %v137_v51, %v131_v36  ;;  %v281_v25 = vld [vmem:[%s782_s2 + $0x18] sm:$0xff] }
 0x118   :  { %v177_v53 = vrot.slane %v115_v38, 7  ;;  %v194_v54 = vrot.slane %v167_v39, 1 }
 0x119   :  { %v84_v55 = vpop.permute.xlu1 %83  ;;  %v76_v56 = vpop.permute.xlu0 %75 }
 0x11a   :  { %v109_v33 = vmul.f32 %v644_v44, %v84_v55  ;;  %v93_v59 = vmul.f32 %v614_v31, %v76_v56  ;;  %v178_v60 = vsel %vm173_vm3, %v175_v52, %v177_v53  ;;  %v180_v62 = vsel %vm173_vm3, %v177_v53, %v179_v50 }
 0x11b   :  { %v195_v63 = vsel %vm190_vm1, %v192_v26, %v194_v54  ;;  %v119_v0 = vmul.f32 %v657_v49, %v76_v56  ;;  %v262_v1 = vsel %vm713_vm4, %v178_v60, 0.0  ;;  %v145_v3 = vmul.f32 %v606_v29, %v76_v56  ;;  %v282_v29 = vld [vmem:[%s782_s2 + $0x20] sm:$0xff] }
 0x11c   :  { %v103_v2 = vadd.f32 %v629_v37, %v93_v59  ;;  %v197_v44 = vsel %vm190_vm1, %v194_v54, %v196_v30  ;;  %v130_v31 = vadd.f32 %v649_v46, %v120_v47  ;;  %v266_v5 = vadd.f32 %v262_v1, %v141_v58  ;;  %v283_v46 = vld [vmem:[%s782_s2 + $0x28] sm:$0xff]  ;;  %v280_v30 = vld [vmem:[%s782_s2 + $0x10] sm:$0xff] }
 0x11d   :  { %v267_v6 = vadd.f32 %v180_v62, %v142_v48  ;;  %v161_v49 = vmul.f32 %v626_v35, %v84_v55  ;;  %v129_v8 = vadd.f32 %v634_v41, %v119_v0  ;;  %v155_v37 = vadd.f32 %v636_v42, %v145_v3 }
 0x11e   :  { %v113_v7 = vadd.f32 %v109_v33, %v103_v2  ;;  %v278_v10 = vadd.f32 %v266_v5, %v197_v44  ;;  %v135_v35 = vmul.f32 %v674_v61, %v84_v55  ;;  %v140_v13 = vadd.f32 %v136_v9, %v130_v31 }
 0x11f   :  { %v279_v11 = vadd.f32 %v275_v4, %v267_v6  ;;  %v165_v41 = vadd.f32 %v161_v49, %v155_v37  ;;  %v273_v24 = vsel %vm269_vm6, %v195_v63, 0.0  ;;  %v444_v37 = vld [vmem:[%s784_s4] ss:$0 sm:$0xff]  ;;  %s482_s4 = smov 128  }
 0x120   :  { %v174_v42 = vrot.slane %v113_v7, 7  ;;  %v286_v14 = vadd.f32 %v282_v29, %v278_v10  ;;  %v139_v16 = vadd.f32 %v135_v35, %v129_v8 }
 0x121   :  { %v287_v15 = vadd.f32 %v283_v46, %v279_v11  ;;  %v191_v32 = vrot.slane %v165_v41, 1 }
 0x122   :  { %v176_v17 = vsel %vm173_vm3, %v174_v42, %v175_v52  ;;  %v185_v18 = vsel %vm173_vm3, 0.0, %v174_v42  ;;  %v290_v20 = vmul.f32 %v286_v14, %v286_v14 }
 0x123   :  { %v260_v19 = vsel %vm754_vm5, %v185_v18, 0.0  ;;  %v265_v61 = vadd.f32 %v176_v17, %v140_v13  ;;  %v291_v21 = vmul.f32 %v287_v15, %v287_v15  ;;  %v193_v22 = vsel %vm190_vm1, %v191_v32, %v192_v26 }
 0x124   :  { %v264_v23 = vadd.f32 %v260_v19, %v139_v16  ;;  %v294_v27 = vmul.f32 %v290_v20, %v286_v14 }
 0x125   :  { %v277_v28 = vadd.f32 %v273_v24, %v265_v61  ;;  %v295_v34 = vmul.f32 %v291_v21, %v287_v15 }
 0x126   :  { %v276_v36 = vadd.f32 %v264_v23, %v193_v22  ;;  %v298_v38 = vmul.f32 0.044715, %v294_v27 }
 0x127   :  { %v285_v39 = vadd.f32 %v281_v25, %v277_v28  ;;  %v299_v40 = vmul.f32 0.044715, %v295_v34 }
 0x128   :  { %v284_v43 = vadd.f32 %v280_v30, %v276_v36  ;;  %v302_v45 = vadd.f32 %v298_v38, %v286_v14 }
 0x129   :  { %v289_v47 = vmul.f32 %v285_v39, %v285_v39  ;;  %v303_v48 = vadd.f32 %v299_v40, %v287_v15 }
 0x12a   :  { %v288_v50 = vmul.f32 %v284_v43, %v284_v43  ;;  %v306_v51 = vmul.f32 0.7978846, %v302_v45 }
 0x12b   :  { %v293_v52 = vmul.f32 %v289_v47, %v285_v39  ;;  %v307_v26 = vmul.f32 0.7978846, %v303_v48 }
 0x12c   :  { %v292_v53 = vmul.f32 %v288_v50, %v284_v43  ;;  %445 = vtanh.f32 %v306_v51 }
 0x12d   :  { %v297_v54 = vmul.f32 0.044715, %v293_v52  ;;  %447 = vtanh.f32 %v307_v26 }
 0x12e   :  { %v296_v55 = vmul.f32 0.044715, %v292_v53 }
 0x12f   :  { %v301_v56 = vadd.f32 %v297_v54, %v285_v39 }
 0x130   :  { %v300_v57 = vadd.f32 %v296_v55, %v284_v43 }
 0x131   :  { %v305_v58 = vmul.f32 0.7978846, %v301_v56 }
 0x132   :  { %v304_v33 = vmul.f32 0.7978846, %v300_v57  ;;  %v446_v59 = vpop.eup %445 }
 0x133   :  { %449 = vtanh.f32 %v305_v58  ;;  %v314_v60 = vadd.f32 1.0, %v446_v59  ;;  %v448_v62 = vpop.eup %447 }
 0x134   :  { %451 = vtanh.f32 %v304_v33  ;;  %v315_v1 = vadd.f32 1.0, %v448_v62 }
 0x135   :  { %v318_v63 = vmul.f32 0.5, %v314_v60 }
 0x136   :  { %v319_v5 = vmul.f32 0.5, %v315_v1 }
 0x137   :  { %v322_v0 = vmul.f32 %v318_v63, %v286_v14 }
 0x138   :  { %v323_v8 = vmul.f32 %v319_v5, %v287_v15 }
 0x139   :  { %v450_v2 = vpop.eup %449  ;;  %366 = vmatmul.f32.vlgmr.msra.gmra.mxu3 %v322_v0 }
 0x13a   :  { %v452_v3 = vpop.eup %451  ;;  %v313_v44 = vadd.f32 1.0, %v450_v2 }
 0x13b   :  { %v312_v31 = vadd.f32 1.0, %v452_v3 }
 0x13c   :  { %v317_v4 = vmul.f32 0.5, %v313_v44 }
 0x13d   :  { %v316_v6 = vmul.f32 0.5, %v312_v31 }
 0x13e   :  { %v321_v49 = vmul.f32 %v317_v4, %v285_v39 }
 0x13f   :  { %v320_v7 = vmul.f32 %v316_v6, %v284_v43 }
 0x140   :  { %363 = vmatmul.f32.vlgmr.msra.gmra.mxu2 %v321_v49 }
 0x141   :  { %360 = vmatmul.f32.vlgmr.msra.gmra.mxu1 %v320_v7  ;;  %369 = vmatmul.f32.gmra.mxu3 %v323_v8 }
 0x1bc   :  { %v367_v29 = vpop.f32.mrf.mxu3 }
 0x1bd   :  { %v368_v46 = vadd.f32 %v444_v37, %v367_v29 }
 0x1be   :  { %v361_v9 = vpop.f32.mrf.mxu1 }
 0x1bf   :  { %v362_v10 = vadd.f32 %v444_v37, %v361_v9  ;;  %375 = vst.msk [vmem:[#allocation2 + $0x10] sm:$0xff] %vm33_vm0, %v368_v46 }
 0x1c1   :  { %373 = vst.msk [vmem:[#allocation2] sm:$0xff] %vm33_vm0, %v362_v10 }
 0x1c3   :  { %v364_v11 = vpop.f32.mrf.mxu2 }
 0x1c4   :  { %v365_v35 = vadd.f32 %v444_v37, %v364_v11  ;;  %v370_v12 = vpop.f32.mrf.mxu3 }
 0x1c5   :  { %v371_v41 = vadd.f32 %v444_v37, %v370_v12 }
 0x1c6   :  { %374 = vst.msk [vmem:[#allocation2 + $0x8] sm:$0xff] %vm33_vm0, %v365_v35 }
 0x1c7   :  { %376 = vst.msk [vmem:[#allocation2 + $0x18] sm:$0xff] %vm33_vm0, %v371_v41 }
 0x1c8   :  { %389 = dma.vmem_to_hbm [thread:$0]  %s382_s27, 512, %s384_s25, [#allocation3], %s482_s4, %s482_s4, %s480_s17  }
 0x1c9   :  { %477 = dma.done.wait [#allocation3], 512  }
 0x1ca   :  { %478 = vsyncadd [#allocation3], 4294966784 }
 0x1cb   :  { %394 = vsyncpa [#allocation3], 1 }

</bundles_post_ra>
